<compile_context>
chip_gen: v6e
topology: v6e:2x2x1
jax: 0.10.0
libtpu: 0.0.40
codegen_flags: <defaults>
</compile_context>

<pallas_src>
import jax
import jax.numpy as jnp
from jax import lax
from jax.experimental import pallas as pl
from jax.experimental.pallas import tpu as pltpu

N = 2            # batch
CIN = 16         # in_size
RED = 4          # reduction
CMID = CIN // RED
H = W = 16       # spatial
M = N * H * W    # flattened batch*spatial (lane axis), 512
EPS = 1e-5       # BatchNorm eps


def se_kernel(x_ref, w1_ref, b1_ref, w2_ref, b2_ref, o_ref):
    # x_ref: (CIN, M) with channels on sublanes, pixels on lanes (lane-dense).
    x = x_ref[...]

    # conv1 (1x1, BN folded) -> ReLU            : (CMID, CIN) @ (CIN, M)
    h = jnp.dot(w1_ref[...], x, preferred_element_type=jnp.float32)
    h = jnp.maximum(h + b1_ref[...], 0.0)

    # conv2 (1x1, BN folded)                    : (CIN, CMID) @ (CMID, M)
    g = jnp.dot(w2_ref[...], h, preferred_element_type=jnp.float32)
    g = g + b2_ref[...]

    # hsigmoid: relu6(g + 3) / 6
    gate = jnp.clip(g + 3.0, 0.0, 6.0) * (1.0 / 6.0)

    # elementwise re-weighting, full-lane (512-wide) store
    o_ref[...] = x * gate


def _fold_bn(gamma, beta, mean, var):
    s = gamma / jnp.sqrt(var + EPS)
    b = beta - mean * s
    return s, b


def se_forward(x_nchw, params):
    """SeModule forward. x_nchw: (N, CIN, H, W) float32, PyTorch layout."""
    w1, bn1, w2, bn2 = params
    n, c, h, w = x_nchw.shape
    m = n * h * w

    # (N, C, H, W) -> (C, N*H*W): channels on sublanes, pixels on lanes.
    x_cm = jnp.transpose(x_nchw, (1, 0, 2, 3)).reshape(c, m).astype(jnp.float32)

    # Fold BN scale into the 1x1 conv weights; keep only a per-channel bias.
    s1, b1 = _fold_bn(*bn1)
    s2, b2 = _fold_bn(*bn2)
    w1_mat = (w1[:, :, 0, 0] * s1[:, None]).astype(jnp.float32)   # (CMID, CIN)
    w2_mat = (w2[:, :, 0, 0] * s2[:, None]).astype(jnp.float32)   # (CIN, CMID)
    b1_col = b1.reshape(CMID, 1).astype(jnp.float32)
    b2_col = b2.reshape(c, 1).astype(jnp.float32)

    out_cm = pl.pallas_call(
        se_kernel,
        out_shape=jax.ShapeDtypeStruct((c, m), jnp.float32),
        grid=(1,),
        in_specs=[
            pl.BlockSpec((c, m), lambda i: (0, 0)),
            pl.BlockSpec((CMID, c), lambda i: (0, 0)),
            pl.BlockSpec((CMID, 1), lambda i: (0, 0)),
            pl.BlockSpec((c, CMID), lambda i: (0, 0)),
            pl.BlockSpec((c, 1), lambda i: (0, 0)),
        ],
        out_specs=pl.BlockSpec((c, m), lambda i: (0, 0)),
        compiler_params=pltpu.CompilerParams(
            dimension_semantics=("arbitrary",)),
    )(x_cm, w1_mat, b1_col, w2_mat, b2_col)

    # (C, N*H*W) -> (N, C, H, W)
    return jnp.transpose(out_cm.reshape(c, n, h, w), (1, 0, 2, 3))


def ref_forward(x, params):
    """Pure-JAX reference mirroring the PyTorch forward (eval-mode BN)."""
    w1, bn1, w2, bn2 = params

    def bn(y, g, b, m, v):
        g, b, m, v = (t[None, :, None, None] for t in (g, b, m, v))
        return (y - m) / jnp.sqrt(v + EPS) * g + b

    dn = ('NCHW', 'OIHW', 'NCHW')
    y = lax.conv_general_dilated(x, w1, (1, 1), 'VALID', dimension_numbers=dn)
    y = jnp.maximum(bn(y, *bn1), 0.0)
    y = lax.conv_general_dilated(y, w2, (1, 1), 'VALID', dimension_numbers=dn)
    y = bn(y, *bn2)
    y = jnp.clip(y + 3.0, 0.0, 6.0) / 6.0          # hsigmoid
    return x * y


def make_params(key):
    ks = jax.random.split(key, 4)

    def bn_params(k, c):
        k1, k2, k3, k4 = jax.random.split(k, 4)
        gamma = 1.0 + 0.1 * jax.random.normal(k1, (c,), jnp.float32)
        beta = 0.1 * jax.random.normal(k2, (c,), jnp.float32)
        mean = 0.1 * jax.random.normal(k3, (c,), jnp.float32)
        var = jax.random.uniform(k4, (c,), jnp.float32, 0.5, 1.5)
        return (gamma, beta, mean, var)

    w1 = 0.2 * jax.random.normal(ks[0], (CMID, CIN, 1, 1), jnp.float32)
    w2 = 0.2 * jax.random.normal(ks[1], (CIN, CMID, 1, 1), jnp.float32)
    return (w1, bn_params(ks[2], CMID), w2, bn_params(ks[3], CIN))


if __name__ == "__main__":
    key = jax.random.PRNGKey(0)
    kx, kp = jax.random.split(key)
    x = jax.random.normal(kx, (N, CIN, H, W), jnp.float32)   # NCHW, like PyTorch
    params = make_params(kp)

    out = jax.block_until_ready(se_forward(x, params))
    ref = jax.block_until_ready(ref_forward(x, params))

    assert out.shape == (N, CIN, H, W), out.shape
    assert jnp.allclose(out, ref, atol=1e-4, rtol=1e-4), float(
        jnp.max(jnp.abs(out - ref)))
    print("KERNEL_OK")
</pallas_src>

<mosaic_0001>
module attributes {stable_mosaic.version = 11 : i64} {
  func.func @se_kernel(%arg0: i32, %arg1: memref<16x512xf32, #tpu.memory_space<vmem>>, %arg2: memref<4x16xf32, #tpu.memory_space<vmem>>, %arg3: memref<4x1xf32, #tpu.memory_space<vmem>>, %arg4: memref<16x4xf32, #tpu.memory_space<vmem>>, %arg5: memref<16x1xf32, #tpu.memory_space<vmem>>, %arg6: memref<16x512xf32, #tpu.memory_space<vmem>>) attributes {dimension_semantics = [#tpu.dimension_semantics<arbitrary>], iteration_bounds = array<i64: 1>, scalar_prefetch = 0 : i64, scratch_operands = 0 : i64, tpu.core_type = #tpu.core_type<tc>, window_params = [{pipeline_mode = #tpu.pipeline_mode<synchronous>, transform_indices = @transform_0, window_bounds = array<i64: 16, 512>}, {pipeline_mode = #tpu.pipeline_mode<synchronous>, transform_indices = @transform_1, window_bounds = array<i64: 4, 16>}, {pipeline_mode = #tpu.pipeline_mode<synchronous>, transform_indices = @transform_2, window_bounds = array<i64: 4, 1>}, {pipeline_mode = #tpu.pipeline_mode<synchronous>, transform_indices = @transform_3, window_bounds = array<i64: 16, 4>}, {pipeline_mode = #tpu.pipeline_mode<synchronous>, transform_indices = @transform_4, window_bounds = array<i64: 16, 1>}, {pipeline_mode = #tpu.pipeline_mode<synchronous>, transform_indices = @transform_5, window_bounds = array<i64: 16, 512>}]} {
    %c0 = arith.constant 0 : index
    %c0_0 = arith.constant 0 : index
    %0 = vector.load %arg1[%c0, %c0_0] : memref<16x512xf32, #tpu.memory_space<vmem>>, vector<16x512xf32>
    %c0_1 = arith.constant 0 : index
    %c0_2 = arith.constant 0 : index
    %1 = vector.load %arg2[%c0_1, %c0_2] : memref<4x16xf32, #tpu.memory_space<vmem>>, vector<4x16xf32>
    %cst = arith.constant dense<0.000000e+00> : vector<4x512xf32>
    %2 = tpu.matmul %1, %0, %cst {dimension_numbers = #tpu.dot_dimension_numbers<[1], [0], [0], [1], [0, 0, 1, 1], [], []>} : vector<4x16xf32>, vector<16x512xf32>, vector<4x512xf32> -> vector<4x512xf32>
    %c0_3 = arith.constant 0 : index
    %c0_4 = arith.constant 0 : index
    %3 = vector.load %arg3[%c0_3, %c0_4] : memref<4x1xf32, #tpu.memory_space<vmem>>, vector<4x1xf32>
    %4 = vector.broadcast %3 : vector<4x1xf32> to vector<4x512xf32>
    %5 = arith.addf %2, %4 : vector<4x512xf32>
    %cst_5 = arith.constant 0.000000e+00 : f32
    %6 = vector.broadcast %cst_5 : f32 to vector<4x512xf32>
    %7 = arith.maximumf %5, %6 : vector<4x512xf32>
    %c0_6 = arith.constant 0 : index
    %c0_7 = arith.constant 0 : index
    %8 = vector.load %arg4[%c0_6, %c0_7] : memref<16x4xf32, #tpu.memory_space<vmem>>, vector<16x4xf32>
    %cst_8 = arith.constant dense<0.000000e+00> : vector<16x512xf32>
    %9 = tpu.matmul %8, %7, %cst_8 {dimension_numbers = #tpu.dot_dimension_numbers<[1], [0], [0], [1], [0, 0, 1, 1], [], []>} : vector<16x4xf32>, vector<4x512xf32>, vector<16x512xf32> -> vector<16x512xf32>
    %c0_9 = arith.constant 0 : index
    %c0_10 = arith.constant 0 : index
    %10 = vector.load %arg5[%c0_9, %c0_10] : memref<16x1xf32, #tpu.memory_space<vmem>>, vector<16x1xf32>
    %11 = vector.broadcast %10 : vector<16x1xf32> to vector<16x512xf32>
    %12 = arith.addf %9, %11 : vector<16x512xf32>
    %cst_11 = arith.constant 3.000000e+00 : f32
    %13 = vector.broadcast %cst_11 : f32 to vector<16x512xf32>
    %14 = arith.addf %12, %13 : vector<16x512xf32>
    %cst_12 = arith.constant 0.000000e+00 : f32
    %cst_13 = arith.constant 6.000000e+00 : f32
    %15 = vector.broadcast %cst_12 : f32 to vector<16x512xf32>
    %16 = arith.maximumf %15, %14 : vector<16x512xf32>
    %17 = vector.broadcast %cst_13 : f32 to vector<16x512xf32>
    %18 = arith.minimumf %17, %16 : vector<16x512xf32>
    %cst_14 = arith.constant 0.166666672 : f32
    %19 = vector.broadcast %cst_14 : f32 to vector<16x512xf32>
    %20 = arith.mulf %18, %19 : vector<16x512xf32>
    %21 = arith.mulf %0, %20 : vector<16x512xf32>
    %c0_15 = arith.constant 0 : index
    %c0_16 = arith.constant 0 : index
    %22 = vector.load %arg6[%c0_15, %c0_16] : memref<16x512xf32, #tpu.memory_space<vmem>>, vector<16x512xf32>
    tpu.vector_store %arg6[%c0_15, %c0_16], %21 {strides = array<i32>} : memref<16x512xf32, #tpu.memory_space<vmem>>, vector<16x512xf32>,
    return
  }
  func.func @transform_0(%arg0: i32) -> (i32, i32) {
    %c0_i32 = arith.constant 0 : i32
    %c0_i32_0 = arith.constant 0 : i32
    %c0_i32_1 = arith.constant 0 : i32
    return %c0_i32, %c0_i32_0 : i32, i32
  }
  func.func @transform_1(%arg0: i32) -> (i32, i32) {
    %c0_i32 = arith.constant 0 : i32
    %c0_i32_0 = arith.constant 0 : i32
    %c0_i32_1 = arith.constant 0 : i32
    return %c0_i32, %c0_i32_0 : i32, i32
  }
  func.func @transform_2(%arg0: i32) -> (i32, i32) {
    %c0_i32 = arith.constant 0 : i32
    %c0_i32_0 = arith.constant 0 : i32
    %c0_i32_1 = arith.constant 0 : i32
    return %c0_i32, %c0_i32_0 : i32, i32
  }
  func.func @transform_3(%arg0: i32) -> (i32, i32) {
    %c0_i32 = arith.constant 0 : i32
    %c0_i32_0 = arith.constant 0 : i32
    %c0_i32_1 = arith.constant 0 : i32
    return %c0_i32, %c0_i32_0 : i32, i32
  }
  func.func @transform_4(%arg0: i32) -> (i32, i32) {
    %c0_i32 = arith.constant 0 : i32
    %c0_i32_0 = arith.constant 0 : i32
    %c0_i32_1 = arith.constant 0 : i32
    return %c0_i32, %c0_i32_0 : i32, i32
  }
  func.func @transform_5(%arg0: i32) -> (i32, i32) {
    %c0_i32 = arith.constant 0 : i32
    %c0_i32_0 = arith.constant 0 : i32
    %c0_i32_1 = arith.constant 0 : i32
    return %c0_i32, %c0_i32_0 : i32, i32
  }
}

</mosaic_0001>

<bundles_post_ra>
// kernel: tpu_custom_call.1
= control target key start
LH: loop header
LB: loop body
LE: loop exit
PB: predicated region body
PF: predicated region fallthrough
CT: control target
= control target key end

     0   :  { %10 = vsyncpa [#allocation3], 0  ;;  %s613_s0 = inlined_call_operand.hbm [shape: f32[16,512], index: 0, kind: input, shape index: {}]   ;;  %s614_s1 = inlined_call_operand.vmem [shape: f32[4,16], index: 1, kind: input, shape index: {}]   ;;  %s615_s2 = inlined_call_operand.vmem [shape: f32[4,1], index: 2, kind: input, shape index: {}]   ;;  %s616_s3 = inlined_call_operand.vmem [shape: f32[16,4], index: 3, kind: input, shape index: {}]   ;;  %s617_s4 = inlined_call_operand.vmem [shape: f32[16,1], index: 4, kind: input, shape index: {}]   ;;  %s618_s5 = inlined_call_operand.hbm [shape: f32[16,512], index: 5, kind: output, shape index: {}]  }
   0x1   :  { %11 = vsyncpa [#allocation4], 0  ;;  %s515_s18 = smov [#allocation2]  }
   0x2   :  { %s17_s19 = sshll.u32 %s515_s18, 4  ;;  %s18_s19 = int_to_ptr.vmem [resolvable:$true] %s17_s19 }
   0x3   :  { %s479_s20 = scalar_lea.vmem %s18_s19, 1024  ;;  %p484_p1 = scmp.lt.s32.totalorder %s18_s19, %s18_s19 }
   0x4   :  { %p480_p0 = scmp.ne.s32.totalorder %s18_s19, %s479_s20  ;;  %p485_p2 = scmp.lt.s32.totalorder %s479_s20, %s479_s20 }
   0x6   :  { %p486_p3 = por %p485_p2, %p484_p1 }
   0x8   :  { %p487_p4 = pnand %p486_p3, %p480_p0 }
   0xa   :  { %490 = shalt.err (!%p487_p4)
}
   0xb   :  { %s516_s21 = smov 512   ;;  %s517_s22 = smov 32  }
   0xc   :  { %23 = dma.hbm_to_vmem [thread:$0]  %s613_s0, 1024, %s18_s19, [#allocation3], %s516_s21, %s516_s21, %s517_s22  }
   0xd   :  { %511 = dma.done.wait [#allocation3], 1024  }
   0xe   :  { %512 = vsyncadd [#allocation3], 4294966272  ;;  %v518_v0 = vmov 0.0   ;;  %v519_v1 = vmov 0   ;;  %v557_v2 = vld [vmem:[#allocation2 + $0x28] sm:$0xff]  ;;  %v559_v3 = vld [vmem:[#allocation2 + $0x38] sm:$0xff] }
   0xf   :  { %118 = vmatprep.mubr.f32.mxu0 %v518_v0  ;;  %189 = vmatprep.mubr.f32.mxu1 %v518_v0  ;;  %v561_v4 = vld [vmem:[#allocation2 + $0x20] sm:$0xff]  ;;  %v565_v5 = vld [vmem:[#allocation2 + $0x30] sm:$0xff]  ;;  %v567_v6 = vld [vmem:[#allocation2 + $0x8] sm:$0xff]  ;;  %vm50_vm0 = vcmask 130048   ;;  %vm221_vm1 = vcmask 1043456   ;;  %vm214_vm2 = vcmask 31744  }
  0x10   :  { %469 = vset.pattern.permute.xlu0 %v519_v1  ;;  %470 = vset.pattern.permute.xlu1 %v519_v1  ;;  %v569_v7 = vld [vmem:[#allocation2 + $0x18] sm:$0xff]  ;;  %v573_v8 = vld [vmem:[#allocation2] sm:$0xff]  ;;  %v575_v9 = vld [vmem:[#allocation2 + $0x10] sm:$0xff] }
  0x11   :  { %82 = vmatprep.subr.mxu0 %v557_v2  ;;  %153 = vmatprep.subr.mxu1 %v559_v3  ;;  %v43_v10 = vld [vmem:[%s614_s1] sm:$0xf]  ;;  %v203_v13 = vld [vmem:[%s617_s4 + $0x8] sm:$0xff] }
  0x12   :  { %83 = vmatpush1.msra.mxu0 %v561_v4  ;;  %154 = vmatpush1.msra.mxu1 %v565_v5  ;;  %v44_v11 = vld [vmem:[%s615_s2] sm:$0xf]  ;;  %v201_v28 = vld [vmem:[%s616_s3 + $0x8] sm:$0xff] }
  0x13   :  { %84 = vmatprep.subr.mxu0 %v567_v6  ;;  %155 = vmatprep.subr.mxu1 %v569_v7  ;;  %v202_v12 = vld [vmem:[%s617_s4] sm:$0xff] }
  0x14   :  { %85 = vmatpush1.msra.mxu0 %v573_v8  ;;  %156 = vmatpush1.msra.mxu1 %v575_v9  ;;  %v200_v27 = vld [vmem:[%s616_s3] sm:$0xff]  ;;  %s520_s3 = smov [#allocation5]  }
  0x15   :  { %453 = vmatmul.mubr.msk.f32.vlgmr.msra.gmra.mxu0 %vm50_vm0, %v43_v10  ;;  %454 = vmatmul.mubr.msk.f32.vlgmr.msra.gmra.mxu1 %vm50_vm0, %v43_v10  ;;  %s441_s8 = sshll.u32 %s520_s3, 4  ;;  %s442_s8 = int_to_ptr.vmem [resolvable:$true] %s441_s8 }
  0x16   :  { %47 = vperm.xlu0 %469, %v44_v11   ;;  %298 = vmatprep.mubr.f32.mxu0 %v518_v0  ;;  %s491_s9 = scalar_lea.vmem %s442_s8, 1024  ;;  %p496_p6 = scmp.lt.s32.totalorder %s442_s8, %s442_s8 }
  0x17   :  { %375 = vmatprep.mubr.f32.mxu1 %v518_v0  ;;  %211 = vperm.xlu1 %470, %v203_v13   ;;  %p492_p5 = scmp.ne.s32.totalorder %s442_s8, %s491_s9  ;;  %p497_p7 = scmp.lt.s32.totalorder %s491_s9, %s491_s9 }
  0x19   :  { %p498_p8 = por %p497_p7, %p496_p6 }
  0x1a   :  { %206 = vperm.xlu0 %469, %v202_v12  }
  0x1b   :  { %p499_p9 = pnand %p498_p8, %p492_p5 }
  0x91   :  { %v48_v16 = vpop.permute.xlu0 %47 }
  0x92   :  { %v212_v40 = vpop.permute.xlu1 %211 }
  0x95   :  { %v207_v29 = vpop.permute.xlu0 %206 }
  0xd5   :  { %v120_v14 = vpop.f32.mrf.mxu0  ;;  %v191_v15 = vpop.f32.mrf.mxu1 }
  0xd6   :  { %v121_v17 = vadd.f32 %v120_v14, %v48_v16  ;;  %v192_v18 = vadd.f32 %v191_v15, %v48_v16 }
  0xd7   :  { %v122_v19 = vpop.f32.mrf.mxu0  ;;  %v193_v20 = vpop.f32.mrf.mxu1 }
  0xd8   :  { %v123_v21 = vadd.f32 %v122_v19, %v48_v16  ;;  %v194_v22 = vadd.f32 %v193_v20, %v48_v16  ;;  %v196_v25 = vmax.f32 %v121_v17, 0.0  ;;  %v198_v26 = vmax.f32 %v192_v18, 0.0 }
  0xda   :  { %v197_v23 = vmax.f32 %v123_v21, 0.0  ;;  %v199_v24 = vmax.f32 %v194_v22, 0.0 }
  0xdc   :  { %455 = vmatprep.subr.msk.mxu0 %vm221_vm1, %v197_v23  ;;  %459 = vmatprep.subr.msk.mxu1 %vm221_vm1, %v199_v24 }
  0xdd   :  { %456 = vmatpush1.msk.msra.mxu0 %vm221_vm1, %v196_v25  ;;  %460 = vmatpush1.msk.msra.mxu1 %vm221_vm1, %v198_v26 }
  0xde   :  { %457 = vmatmul.mubr.msk.f32.vlgmr.msra.gmra.mxu0 %vm214_vm2, %v200_v27  ;;  %461 = vmatmul.mubr.msk.f32.vlgmr.msra.gmra.mxu1 %vm214_vm2, %v200_v27 }
  0xdf   :  { %304 = vmatprep.mubr.f32.mxu0 %v518_v0  ;;  %381 = vmatprep.mubr.f32.mxu1 %v518_v0 }
  0xe2   :  { %458 = vmatmul.mubr.msk.f32.gmra.mxu0 %vm214_vm2, %v201_v28  ;;  %462 = vmatmul.mubr.msk.f32.gmra.mxu1 %vm214_vm2, %v201_v28 }
 0x19e   :  { %v300_v30 = vpop.f32.mrf.mxu0  ;;  %v377_v31 = vpop.f32.mrf.mxu1 }
 0x19f   :  { %v301_v32 = vadd.f32 %v300_v30, %v207_v29  ;;  %v378_v33 = vadd.f32 %v377_v31, %v207_v29 }
 0x1a0   :  { %v302_v34 = vpop.f32.mrf.mxu0  ;;  %v379_v35 = vpop.f32.mrf.mxu1 }
 0x1a1   :  { %v388_v36 = vadd.f32 3.0, %v301_v32  ;;  %v390_v37 = vadd.f32 3.0, %v378_v33  ;;  %v303_v38 = vadd.f32 %v302_v34, %v207_v29  ;;  %v380_v39 = vadd.f32 %v379_v35, %v207_v29 }
 0x1a2   :  { %v306_v41 = vpop.f32.mrf.mxu0  ;;  %v383_v42 = vpop.f32.mrf.mxu1 }
 0x1a3   :  { %v396_v43 = vmax.f32 %v388_v36, 0.0  ;;  %v398_v44 = vmax.f32 %v390_v37, 0.0  ;;  %v389_v45 = vadd.f32 3.0, %v303_v38  ;;  %v391_v46 = vadd.f32 3.0, %v380_v39 }
 0x1a4   :  { %v307_v47 = vadd.f32 %v306_v41, %v212_v40  ;;  %v384_v48 = vadd.f32 %v383_v42, %v212_v40  ;;  %v308_v49 = vpop.f32.mrf.mxu0  ;;  %v385_v50 = vpop.f32.mrf.mxu1 }
 0x1a5   :  { %v404_v51 = vmin.f32 %v396_v43, 6.0  ;;  %v406_v52 = vmin.f32 %v398_v44, 6.0  ;;  %v397_v53 = vmax.f32 %v389_v45, 0.0  ;;  %v399_v54 = vmax.f32 %v391_v46, 0.0 }
 0x1a6   :  { %v392_v55 = vadd.f32 3.0, %v307_v47  ;;  %v394_v56 = vadd.f32 3.0, %v384_v48  ;;  %v309_v57 = vadd.f32 %v308_v49, %v212_v40  ;;  %v386_v58 = vadd.f32 %v385_v50, %v212_v40 }
 0x1a7   :  { %v412_v59 = vmul.f32 0.16666667, %v404_v51  ;;  %v414_v60 = vmul.f32 0.16666667, %v406_v52  ;;  %v405_v61 = vmin.f32 %v397_v53, 6.0  ;;  %v407_v62 = vmin.f32 %v399_v54, 6.0 }
 0x1a8   :  { %v400_v63 = vmax.f32 %v392_v55, 0.0  ;;  %v402_v0 = vmax.f32 %v394_v56, 0.0  ;;  %v393_v1 = vadd.f32 3.0, %v309_v57  ;;  %v395_v10 = vadd.f32 3.0, %v386_v58 }
 0x1a9   :  { %v420_v11 = vmul.f32 %v412_v59, %v573_v8  ;;  %v422_v12 = vmul.f32 %v414_v60, %v575_v9  ;;  %v413_v13 = vmul.f32 0.16666667, %v405_v61  ;;  %v415_v14 = vmul.f32 0.16666667, %v407_v62 }
 0x1aa   :  { %v408_v15 = vmin.f32 %v400_v63, 6.0  ;;  %v410_v16 = vmin.f32 %v402_v0, 6.0  ;;  %v401_v17 = vmax.f32 %v393_v1, 0.0  ;;  %v403_v18 = vmax.f32 %v395_v10, 0.0 }
 0x1ab   :  { %428 = vst [vmem:[#allocation5] sm:$0xff] %v420_v11  ;;  %430 = vst [vmem:[#allocation5 + $0x10] sm:$0xff] %v422_v12  ;;  %v421_v19 = vmul.f32 %v413_v13, %v567_v6  ;;  %v423_v20 = vmul.f32 %v415_v14, %v569_v7 }
 0x1ac   :  { %v416_v21 = vmul.f32 0.16666667, %v408_v15  ;;  %v418_v22 = vmul.f32 0.16666667, %v410_v16  ;;  %v409_v23 = vmin.f32 %v401_v17, 6.0  ;;  %v411_v24 = vmin.f32 %v403_v18, 6.0 }
 0x1ad   :  { %429 = vst [vmem:[#allocation5 + $0x8] sm:$0xff] %v421_v19  ;;  %431 = vst [vmem:[#allocation5 + $0x18] sm:$0xff] %v423_v20 }
 0x1ae   :  { %v424_v8 = vmul.f32 %v416_v21, %v561_v4  ;;  %v426_v9 = vmul.f32 %v418_v22, %v565_v5  ;;  %v417_v25 = vmul.f32 0.16666667, %v409_v23  ;;  %v419_v26 = vmul.f32 0.16666667, %v411_v24 }
 0x1b0   :  { %432 = vst [vmem:[#allocation5 + $0x20] sm:$0xff] %v424_v8  ;;  %434 = vst [vmem:[#allocation5 + $0x30] sm:$0xff] %v426_v9  ;;  %v425_v6 = vmul.f32 %v417_v25, %v557_v2  ;;  %v427_v7 = vmul.f32 %v419_v26, %v559_v3 }
 0x1b2   :  { %433 = vst [vmem:[#allocation5 + $0x28] sm:$0xff] %v425_v6  ;;  %435 = vst [vmem:[#allocation5 + $0x38] sm:$0xff] %v427_v7 }
 0x1b3   :  { %502 = shalt.err (!%p499_p9)
}
 0x1b4   :  { %447 = dma.vmem_to_hbm [thread:$0]  %s442_s8, 1024, %s618_s5, [#allocation4], %s516_s21, %s516_s21, %s517_s22  }
 0x1b5   :  { %513 = dma.done.wait [#allocation4], 1024  }
 0x1b6   :  { %514 = vsyncadd [#allocation4], 4294966272 }
 0x1b7   :  { %451 = vsyncpa [#allocation3], 1 }
 0x1b8   :  { %452 = vsyncpa [#allocation4], 1 }

</bundles_post_ra>
